<compile_context>
chip_gen: v6e
topology: v6e:2x2x1
jax: 0.10.0
libtpu: 0.0.40
codegen_flags: <defaults>
</compile_context>

<pallas_src>
import math
import functools

import jax
import jax.numpy as jnp
from jax.experimental import pallas as pl
from jax.experimental.pallas import tpu as pltpu


_LANE = 128
_VMEM_LIMIT_BYTES = 32 * 1024 * 1024      # within physical VMEM on v5e/v6e/v7x
_X_BLOCK_TARGET = 4 * 1024 * 1024         # ~4 MiB of features per grid step
_TOTAL_VMEM_BUDGET = 24 * 1024 * 1024     # double-buffered blocks, incl. padding


# ----------------------------------------------------------------------------
# __init__-time buffer construction (plain JAX glue) -- mirrors the torch code.
# ----------------------------------------------------------------------------
def build_pe(d_model, max_spatial_shape):
    X, Y, Z = (int(s) for s in max_spatial_shape)
    assert d_model % 6 == 0, f"Feature dimension {d_model} not divisible by 6"
    d = d_model // 3

    div_term = jnp.exp(
        jnp.arange(0.0, d, 2, dtype=jnp.float32) * -(math.log(10000.0) / d)
    )  # (d/2,)

    pos_x = jnp.arange(0.0, X, dtype=jnp.float32)[:, None]  # (X, 1)
    pos_y = jnp.arange(0.0, Y, dtype=jnp.float32)[:, None]  # (Y, 1)
    pos_z = jnp.arange(0.0, Z, dtype=jnp.float32)[:, None]  # (Z, 1)

    sx, cx = jnp.sin(pos_x * div_term).T, jnp.cos(pos_x * div_term).T  # (d/2, X)
    sy, cy = jnp.sin(pos_y * div_term).T, jnp.cos(pos_y * div_term).T  # (d/2, Y)
    sz, cz = jnp.sin(pos_z * div_term).T, jnp.cos(pos_z * div_term).T  # (d/2, Z)

    pe = jnp.zeros((d_model, X, Y, Z), dtype=jnp.float32)
    pe = pe.at[0:d:2, ...].set(sx[:, :, None, None])
    pe = pe.at[1:d:2, ...].set(cx[:, :, None, None])
    pe = pe.at[d:2 * d:2, ...].set(sy[:, None, :, None])
    pe = pe.at[d + 1:2 * d:2, ...].set(cy[:, None, :, None])
    pe = pe.at[2 * d:3 * d:2, ...].set(sz[:, None, None, :])
    pe = pe.at[2 * d + 1:3 * d:2, ...].set(cz[:, None, None, :])
    return pe  # (d_model, X, Y, Z)


# ----------------------------------------------------------------------------
# Kernels: pure broadcast-add, and broadcast-add fused with a dropout mask.
# ----------------------------------------------------------------------------
def _add_pe_kernel(x_ref, pe_ref, o_ref):
    # x: (B, TR, 128) or (B, TM);  pe: (1, TR, 128) or (1, TM) -> broadcast add
    o_ref[...] = x_ref[...] + pe_ref[...]


def _add_pe_dropout_kernel(x_ref, pe_ref, m_ref, o_ref):
    # mask already carries the 1/(1-p) inverted-dropout scale (or 0).
    o_ref[...] = (x_ref[...] + pe_ref[...]) * m_ref[...]


# ----------------------------------------------------------------------------
# Tile sizing with correct (sublane-padded) VMEM accounting.
# ----------------------------------------------------------------------------
def _round_up(x, m):
    return (x + m - 1) // m * m


def _choose_rows(R, B, itemsize, n_streams):
    """Rows per block for the lane-dense 3-D layout (B, TR, 128).

    n_streams = number of full-size (B, TR, 128) blocks streamed per step
    (x + out [+ mask]); pe adds one (1, TR, 128) block.  All double-buffered.
    TR is a multiple of 8 and the lane dim is exactly 128 -> no padding.
    """
    bytes_per_row_x = B * _LANE * itemsize
    tr_from_x = _X_BLOCK_TARGET // max(1, bytes_per_row_x)
    bytes_per_row_total = 2 * (n_streams * B + 1) * _LANE * itemsize
    tr_from_total = _TOTAL_VMEM_BUDGET // max(1, bytes_per_row_total)
    tr = max(8, (min(tr_from_x, tr_from_total) // 8) * 8)
    if tr >= R:
        return int(R)          # single block spanning the full axis (allowed)
    return int(tr)


def _choose_flat_tile(M, B, itemsize, n_streams):
    """Lane tile for the 2-D fallback layout (B, TM); TM multiple of 128.

    VMEM accounting uses the *padded* sublane count: a (B, TM) block occupies
    round_up(B, 8) sublanes for 32-bit dtypes (16 for 16-bit), and the (1, TM)
    pe block occupies one full sublane group as well.
    """
    sub = 8 if itemsize >= 4 else 16
    bp = _round_up(B, sub)
    per_lane_x = bp * itemsize
    tm_from_x = _X_BLOCK_TARGET // max(1, per_lane_x)
    per_lane_total = 2 * (n_streams * bp + sub) * itemsize
    tm_from_total = _TOTAL_VMEM_BUDGET // max(1, per_lane_total)
    tm = max(_LANE, (min(tm_from_x, tm_from_total) // _LANE) * _LANE)
    if tm >= M:
        return int(M)
    return int(tm)


# ----------------------------------------------------------------------------
# pallas_call wrapper (handles both layouts, eval and training).
# ----------------------------------------------------------------------------
@jax.jit
def _pallas_add_pe(x, pe, mask=None):
    """x: (B, R, 128) or (B, M); pe: (1, R, 128) or (1, M); mask like x or None."""
    B = x.shape[0]
    itemsize = jnp.dtype(x.dtype).itemsize
    n_streams = 2 if mask is None else 3

    if x.ndim == 3:
        _, R, L = x.shape
        TR = _choose_rows(R, B, itemsize, n_streams)
        grid = (pl.cdiv(R, TR),)
        x_spec = pl.BlockSpec((B, TR, L), lambda i: (0, i, 0))
        pe_spec = pl.BlockSpec((1, TR, L), lambda i: (0, i, 0))
    else:
        _, M = x.shape
        TM = _choose_flat_tile(M, B, itemsize, n_streams)
        grid = (pl.cdiv(M, TM),)
        x_spec = pl.BlockSpec((B, TM), lambda i: (0, i))
        pe_spec = pl.BlockSpec((1, TM), lambda i: (0, i))

    if mask is None:
        kernel = _add_pe_kernel
        in_specs = [x_spec, pe_spec]
        operands = (x, pe)
    else:
        kernel = _add_pe_dropout_kernel
        in_specs = [x_spec, pe_spec, x_spec]
        operands = (x, pe, mask)

    # TODO(synk): on v7x, pltpu.CORE_PARALLEL on this axis may shard tiles
    # across the two TensorCores; "parallel" is kept for portability.
    return pl.pallas_call(
        kernel,
        out_shape=jax.ShapeDtypeStruct(x.shape, x.dtype),
        grid=grid,
        in_specs=in_specs,
        out_specs=x_spec,
        compiler_params=pltpu.CompilerParams(
            dimension_semantics=("parallel",),
            vmem_limit_bytes=_VMEM_LIMIT_BYTES),
    )(*operands)


# ----------------------------------------------------------------------------
# Module-like wrapper
# ----------------------------------------------------------------------------
class FrequencyPositionalEncoding3d:
    def __init__(self, d_model, max_spatial_shape, dropout=0.1):
        assert len(max_spatial_shape) == 3, "Spatial dimension must be 3"
        assert d_model % 6 == 0, f"Feature dimension {d_model} not divisible by 6"
        self.d_model = d_model
        self.max_spatial_shape = tuple(int(s) for s in max_spatial_shape)
        self.dropout_p = float(dropout)
        self.pe = build_pe(d_model, self.max_spatial_shape)  # (F, X, Y, Z)
        self._pe_cache = {}
        # Pre-build the default (full-grid, f32) flattened pe so the per-call
        # hot path never pays the transpose.
        self._get_pe(self.max_spatial_shape, jnp.float32)

    def _get_pe(self, grid_size, dtype):
        gx, gy, gz = (int(s) for s in grid_size)
        n = gx * gy * gz
        m = n * self.d_model
        use_3d = (m % _LANE == 0)
        key = (gx, gy, gz, jnp.dtype(dtype).name, use_3d)
        pe_flat = self._pe_cache.get(key)
        if pe_flat is None:
            # permute(1,2,3,0).view(N, F): x slowest, z fastest, channel last;
            # then flatten into the kernel's lane-dense layout.
            pe_flat = jnp.transpose(self.pe[:, :gx, :gy, :gz], (1, 2, 3, 0))
            pe_flat = pe_flat.reshape(-1).astype(dtype)
            if use_3d:
                pe_flat = pe_flat.reshape(1, m // _LANE, _LANE)
            else:
                pe_flat = pe_flat.reshape(1, m)
            pe_flat = jax.block_until_ready(pe_flat)
            self._pe_cache[key] = pe_flat
        return pe_flat, use_3d

    def __call__(self, point_features, positional_input=None, grid_size=None,
                 training=False, rng=None):
        del positional_input  # unused by the reference forward (as in torch)
        assert point_features.ndim == 3
        B, N, F = point_features.shape
        if grid_size is None:
            grid_size = self.max_spatial_shape
        gx, gy, gz = (int(s) for s in grid_size)
        assert N == gx * gy * gz
        assert F == self.d_model

        pe_flat, use_3d = self._get_pe((gx, gy, gz), point_features.dtype)
        M = N * F
        if use_3d:
            x = point_features.reshape(B, M // _LANE, _LANE)   # free reshape
        else:
            x = point_features.reshape(B, M)

        p = self.dropout_p
        if training and p > 0.0:
            if p >= 1.0:
                return jnp.zeros_like(point_features)
            if rng is None:
                rng = jax.random.PRNGKey(0)
            keep = jax.random.bernoulli(rng, 1.0 - p, shape=x.shape)
            scale = jnp.asarray(1.0 / (1.0 - p), point_features.dtype)
            mask = keep.astype(point_features.dtype) * scale
            out = _pallas_add_pe(x, pe_flat, mask)
        else:
            out = _pallas_add_pe(x, pe_flat)
        return out.reshape(B, N, F)


if __name__ == "__main__":
    # Small shapes: d_model=48 (divisible by 6), spatial grid (4,4,4) -> N=64, batch=2.
    key = jax.random.PRNGKey(0)
    k1, k2, k3 = jax.random.split(key, 3)
    B, d_model = 2, 48
    spatial = (4, 4, 4)
    N = spatial[0] * spatial[1] * spatial[2]

    point_features = jax.random.normal(k1, (B, N, d_model), dtype=jnp.float32)
    positional_input = jax.random.normal(k2, (B, N, 3), dtype=jnp.float32)

    module = FrequencyPositionalEncoding3d(d_model, spatial, dropout=0.1)

    # Eval-mode forward (dropout is identity, matching torch .eval()).
    out = module(point_features, positional_input, training=False)
    out = jax.block_until_ready(out)

    # Reference (plain JAX) check of the eval-mode forward.
    pe_ref = jnp.transpose(module.pe, (1, 2, 3, 0)).reshape(1, N, d_model)
    ref = point_features + pe_ref
    assert out.shape == (B, N, d_model)
    assert jnp.allclose(out, ref, atol=1e-5, rtol=1e-5)

    # Training-mode forward exercises the fused inverted-dropout path.
    p = module.dropout_p
    out_tr = module(point_features, positional_input, training=True, rng=k3)
    out_tr = jax.block_until_ready(out_tr)
    assert out_tr.shape == (B, N, d_model)
    assert bool(jnp.all(jnp.isfinite(out_tr)))
    dropped = (out_tr == 0.0)
    drop_frac = float(jnp.mean(dropped.astype(jnp.float32)))
    assert 0.02 < drop_frac < 0.30, f"unexpected drop fraction {drop_frac}"
    # Kept elements must equal ref / (1 - p).
    rescaled = jnp.where(dropped, ref, out_tr * (1.0 - p))
    assert jnp.allclose(rescaled, ref, atol=1e-4, rtol=1e-4)

    print("KERNEL_OK")
</pallas_src>

<mosaic_0001>
module attributes {stable_mosaic.version = 11 : i64} {
  func.func @_add_pe_kernel(%arg0: i32, %arg1: memref<2x24x128xf32, #tpu.memory_space<vmem>>, %arg2: memref<1x24x128xf32, #tpu.memory_space<vmem>>, %arg3: memref<2x24x128xf32, #tpu.memory_space<vmem>>) attributes {dimension_semantics = [#tpu.dimension_semantics<parallel>], iteration_bounds = array<i64: 1>, scalar_prefetch = 0 : i64, scratch_operands = 0 : i64, tpu.core_type = #tpu.core_type<tc>, window_params = [{transform_indices = @transform_0, window_bounds = array<i64: 2, 24, 128>}, {transform_indices = @transform_1, window_bounds = array<i64: 1, 24, 128>}, {transform_indices = @transform_2, window_bounds = array<i64: 2, 24, 128>}]} {
    %c0 = arith.constant 0 : index
    %c0_0 = arith.constant 0 : index
    %c0_1 = arith.constant 0 : index
    %0 = vector.load %arg1[%c0, %c0_0, %c0_1] : memref<2x24x128xf32, #tpu.memory_space<vmem>>, vector<2x24x128xf32>
    %c0_2 = arith.constant 0 : index
    %c0_3 = arith.constant 0 : index
    %c0_4 = arith.constant 0 : index
    %1 = vector.load %arg2[%c0_2, %c0_3, %c0_4] : memref<1x24x128xf32, #tpu.memory_space<vmem>>, vector<1x24x128xf32>
    %2 = vector.broadcast %1 : vector<1x24x128xf32> to vector<2x24x128xf32>
    %3 = arith.addf %0, %2 : vector<2x24x128xf32>
    %c0_5 = arith.constant 0 : index
    %c0_6 = arith.constant 0 : index
    %c0_7 = arith.constant 0 : index
    %4 = vector.load %arg3[%c0_5, %c0_6, %c0_7] : memref<2x24x128xf32, #tpu.memory_space<vmem>>, vector<2x24x128xf32>
    tpu.vector_store %arg3[%c0_5, %c0_6, %c0_7], %3 {strides = array<i32>} : memref<2x24x128xf32, #tpu.memory_space<vmem>>, vector<2x24x128xf32>,
    return
  }
  func.func @transform_0(%arg0: i32) -> (i32, i32, i32) {
    %c0_i32 = arith.constant 0 : i32
    %c0_i32_0 = arith.constant 0 : i32
    %c0_i32_1 = arith.constant 0 : i32
    return %c0_i32, %arg0, %c0_i32_0 : i32, i32, i32
  }
  func.func @transform_1(%arg0: i32) -> (i32, i32, i32) {
    %c0_i32 = arith.constant 0 : i32
    %c0_i32_0 = arith.constant 0 : i32
    %c0_i32_1 = arith.constant 0 : i32
    return %c0_i32, %arg0, %c0_i32_0 : i32, i32, i32
  }
  func.func @transform_2(%arg0: i32) -> (i32, i32, i32) {
    %c0_i32 = arith.constant 0 : i32
    %c0_i32_0 = arith.constant 0 : i32
    %c0_i32_1 = arith.constant 0 : i32
    return %c0_i32, %arg0, %c0_i32_0 : i32, i32, i32
  }
}

</mosaic_0001>

<bundles_post_ra>
// kernel: _pallas_add_pe.1
= control target key start
LH: loop header
LB: loop body
LE: loop exit
PB: predicated region body
PF: predicated region fallthrough
CT: control target
= control target key end

     0   :  { %7 = vsyncpa [#allocation3], 0  ;;  %s188_s0 = inlined_call_operand.hbm [shape: f32[2,24,128], index: 0, kind: input, shape index: {}]   ;;  %s189_s1 = inlined_call_operand.hbm [shape: f32[1,24,128], index: 1, kind: input, shape index: {}]   ;;  %s190_s2 = inlined_call_operand.hbm [shape: f32[2,24,128], index: 2, kind: output, shape index: {}]  }
   0x1   :  { %8 = vsyncpa [#allocation6], 0 }
   0x2   :  { %9 = vsyncpa [#allocation4], 0  ;;  %s150_s9 = smov [#allocation2]  }
   0x3   :  { %s15_s10 = sshll.u32 %s150_s9, 4  ;;  %s16_s10 = int_to_ptr.vmem [resolvable:$true] %s15_s10 }
   0x4   :  { %s92_s11 = scalar_lea.vmem %s16_s10, 768  ;;  %p97_p1 = scmp.lt.s32.totalorder %s16_s10, %s16_s10 }
   0x5   :  { %p93_p0 = scmp.ne.s32.totalorder %s16_s10, %s92_s11  ;;  %p98_p2 = scmp.lt.s32.totalorder %s92_s11, %s92_s11 }
   0x7   :  { %p99_p3 = por %p98_p2, %p97_p1 }
   0x9   :  { %p100_p4 = pnand %p99_p3, %p93_p0 }
   0xb   :  { %103 = shalt.err (!%p100_p4)
}
   0xc   :  { %s151_s12 = smov 128   ;;  %s152_s13 = smov 8  }
   0xd   :  { %21 = dma.hbm_to_vmem [thread:$0]  %s188_s0, 768, %s16_s10, [#allocation3], %s151_s12, %s151_s12, %s152_s13  }
   0xe   :  { %s153_s16 = smov [#allocation5]  }
   0xf   :  { %s27_s17 = sshll.u32 %s153_s16, 4  ;;  %s28_s17 = int_to_ptr.vmem [resolvable:$true] %s27_s17 }
  0x10   :  { %s112_s18 = scalar_lea.vmem %s28_s17, 384  ;;  %p117_p6 = scmp.lt.s32.totalorder %s28_s17, %s28_s17 }
  0x11   :  { %p113_p5 = scmp.ne.s32.totalorder %s28_s17, %s112_s18  ;;  %p118_p7 = scmp.lt.s32.totalorder %s112_s18, %s112_s18 }
  0x13   :  { %p119_p8 = por %p118_p7, %p117_p6 }
  0x15   :  { %p120_p9 = pnand %p119_p8, %p113_p5 }
  0x17   :  { %123 = shalt.err (!%p120_p9)
}
  0x18   :  { %33 = dma.hbm_to_vmem [thread:$0]  %s189_s1, 384, %s28_s17, [#allocation6], %s151_s12, %s151_s12, %s152_s13  }
  0x19   :  { %144 = dma.done.wait [#allocation3], 768  }
  0x1a   :  { %145 = vsyncadd [#allocation3], 4294966528 }
  0x1b   :  { %146 = dma.done.wait [#allocation6], 384  }
  0x1c   :  { %147 = vsyncadd [#allocation6], 4294966912  ;;  %v40_v0 = vld [vmem:[#allocation2] sm:$0xff]  ;;  %v46_v1 = vld [vmem:[#allocation5] sm:$0xff]  ;;  %s154_s0 = smov [#allocation7]  }
  0x1d   :  { %v41_v2 = vld [vmem:[#allocation2 + $0x8] sm:$0xff]  ;;  %s66_s21 = sshll.u32 %s154_s0, 4  ;;  %v49_v3 = vadd.f32 %v46_v1, %v40_v0  ;;  %v47_v4 = vld [vmem:[#allocation5 + $0x8] sm:$0xff]  ;;  %v42_v5 = vld [vmem:[#allocation2 + $0x10] sm:$0xff]  ;;  %s67_s21 = int_to_ptr.vmem [resolvable:$true] %s66_s21 }
  0x1e   :  { %v48_v6 = vld [vmem:[#allocation5 + $0x10] sm:$0xff]  ;;  %v50_v7 = vadd.f32 %v47_v4, %v41_v2  ;;  %v43_v9 = vld [vmem:[#allocation2 + $0x18] sm:$0xff]  ;;  %v45_v11 = vld [vmem:[#allocation2 + $0x28] sm:$0xff]  ;;  %s124_s1 = scalar_lea.vmem %s67_s21, 768  ;;  %p129_p11 = scmp.lt.s32.totalorder %s67_s21, %s67_s21 }
  0x1f   :  { %v51_v8 = vadd.f32 %v48_v6, %v42_v5  ;;  %v44_v10 = vld [vmem:[#allocation2 + $0x20] sm:$0xff]  ;;  %55 = vst [vmem:[#allocation7] sm:$0xff] %v49_v3  ;;  %v52_v12 = vadd.f32 %v46_v1, %v43_v9  ;;  %v54_v14 = vadd.f32 %v48_v6, %v45_v11  ;;  %p125_p10 = scmp.ne.s32.totalorder %s67_s21, %s124_s1  ;;  %p130_p12 = scmp.lt.s32.totalorder %s124_s1, %s124_s1 }
  0x20   :  { %v53_v13 = vadd.f32 %v47_v4, %v44_v10  ;;  %56 = vst [vmem:[#allocation7 + $0x8] sm:$0xff] %v50_v7 }
  0x21   :  { %57 = vst [vmem:[#allocation7 + $0x10] sm:$0xff] %v51_v8  ;;  %58 = vst [vmem:[#allocation7 + $0x18] sm:$0xff] %v52_v12  ;;  %p131_p13 = por %p130_p12, %p129_p11 }
  0x22   :  { %59 = vst [vmem:[#allocation7 + $0x20] sm:$0xff] %v53_v13  ;;  %60 = vst [vmem:[#allocation7 + $0x28] sm:$0xff] %v54_v14 }
  0x23   :  { %p132_p0 = pnand %p131_p13, %p125_p10 }
  0x25   :  { %135 = shalt.err (!%p132_p0)
}
  0x26   :  { %72 = dma.vmem_to_hbm [thread:$0]  %s67_s21, 768, %s190_s2, [#allocation4], %s151_s12, %s151_s12, %s152_s13  }
  0x27   :  { %148 = dma.done.wait [#allocation4], 768  }
  0x28   :  { %149 = vsyncadd [#allocation4], 4294966528 }
  0x29   :  { %76 = vsyncpa [#allocation3], 1 }
  0x2a   :  { %77 = vsyncpa [#allocation6], 1 }
  0x2b   :  { %78 = vsyncpa [#allocation4], 1 }

</bundles_post_ra>
